<compile_context>
chip_gen: v5e
topology: v5e:2x2
jax: 0.10.0
libtpu: 0.0.40
codegen_flags: <defaults>
</compile_context>

<pallas_src>
import jax
import jax.numpy as jnp
from jax.experimental import pallas as pl
from jax.experimental.pallas import tpu as pltpu


INPUT_DIM = 80
HIDDEN = (64, 48, 32, 32)   # encoder widths; omic_dim == 32
OMIC_DIM = 32
LABEL_DIM = 1
LANES = 128

# Row offsets of each (in-dim padded) weight block inside the packed bf16 slab.
W1_OFF, W1_ROWS = 0, INPUT_DIM                 # (80, 128), real (80, 64)
W2_OFF, W2_ROWS = W1_OFF + W1_ROWS, LANES      # (128, 128), real (64, 48)
W3_OFF, W3_ROWS = W2_OFF + W2_ROWS, LANES      # (128, 128), real (48, 32)
W4_OFF, W4_ROWS = W3_OFF + W3_ROWS, LANES      # (128, 128), real (32, 32)
WSLAB_ROWS = W4_OFF + W4_ROWS                  # 464
BSLAB_ROWS = 8                                 # b1..b4, wc_row, bc, 2 pad rows

MAX_TB = 2048                                  # batch tile (rows), multiple of 16


def _round_up(n, m):
    return ((n + m - 1) // m) * m


def _elu(x):
    # nn.ELU(alpha=1): x > 0 -> x, else expm1(x).
    # expm1 is computed via the exact identity expm1(x) = tanh(x/2)*(exp(x)+1),
    # which avoids the cancellation of exp(x)-1 near 0 (matching PyTorch ELU
    # accuracy) while relying only on exp/tanh, which lower cleanly on TPU.
    expm1 = jnp.tanh(0.5 * x) * (jnp.exp(x) + 1.0)
    return jnp.where(x > 0, x, expm1)


def maxnet_kernel(x_ref, wslab_ref, bslab_ref, feat_ref, out_ref):
    x = x_ref[...]                                     # (TB, 80) bf16

    # Static row slices of the resident weight slab (offsets are multiples of 16
    # -> aligned with bf16 sublane packing).
    w1 = wslab_ref[W1_OFF:W1_OFF + W1_ROWS, :]         # (80, 128)  bf16
    w2 = wslab_ref[W2_OFF:W2_OFF + W2_ROWS, :]         # (128, 128) bf16
    w3 = wslab_ref[W3_OFF:W3_OFF + W3_ROWS, :]         # (128, 128) bf16
    w4 = wslab_ref[W4_OFF:W4_OFF + W4_ROWS, :]         # (128, 128) bf16

    b1 = bslab_ref[0:1, :]                             # (1, 128) f32
    b2 = bslab_ref[1:2, :]
    b3 = bslab_ref[2:3, :]
    b4 = bslab_ref[3:4, :]
    wc = bslab_ref[4:5, :]                             # classifier col as a row
    bc = bslab_ref[5:6, 0:1]                           # (1, 1)

    def dense(h_bf16, w, b):
        # bf16 MXU matmul with f32 accumulation; bias add in f32.
        return jnp.dot(h_bf16, w, preferred_element_type=jnp.float32) + b

    # encoder1..3: Linear + ELU (AlphaDropout == identity at inference).
    h = _elu(dense(x, w1, b1))                                   # (TB, 128) f32
    h = _elu(dense(h.astype(jnp.bfloat16), w2, b2))
    h = _elu(dense(h.astype(jnp.bfloat16), w3, b3))

    # encoder4: Linear + ReLU -> features.
    feats = jnp.maximum(dense(h.astype(jnp.bfloat16), w4, b4), 0.0)   # (TB, 128)
    feat_ref[...] = feats[:, :OMIC_DIM].astype(feat_ref.dtype)

    # classifier Linear(32, 1): VPU multiply + cross-lane reduction (no N=1
    # MXU pass).  Padded lanes of feats/wc are exact zeros.
    out = jnp.sum(feats * wc, axis=-1, keepdims=True) + bc
    out_ref[...] = out.astype(out_ref.dtype)
    # TODO(synk): self.act (sigmoid * output_range + output_shift) path is
    # skipped because act=None in the reference constructor default.


def pack_params(params):
    """Pack 5 weight matrices -> one bf16 slab; biases + classifier row -> one
    f32 slab, zero-padded to lane/sublane-friendly shapes."""
    def pad2d(a, rows, cols=LANES):
        out = jnp.zeros((rows, cols), jnp.float32)
        return out.at[: a.shape[0], : a.shape[1]].set(a.astype(jnp.float32))

    wslab = jnp.concatenate(
        [pad2d(params["w1"], W1_ROWS),
         pad2d(params["w2"], W2_ROWS),
         pad2d(params["w3"], W3_ROWS),
         pad2d(params["w4"], W4_ROWS)], axis=0).astype(jnp.bfloat16)

    bslab = jnp.concatenate(
        [pad2d(params["b1"], 1),
         pad2d(params["b2"], 1),
         pad2d(params["b3"], 1),
         pad2d(params["b4"], 1),
         pad2d(params["wc"].T, 1),          # (1, 32) classifier weights as a row
         pad2d(params["bc"], 1),            # classifier bias at lane 0
         jnp.zeros((BSLAB_ROWS - 6, LANES), jnp.float32)], axis=0)
    return wslab, bslab


def maxnet_forward(x, params, *, max_tb=MAX_TB):
    """x: (B, 80) float32 -> (features (B, 32) f32, out (B, 1) f32)."""
    B = x.shape[0]
    wslab, bslab = pack_params(params)

    TB = min(max_tb, _round_up(B, 16))        # multiple of 16 (bf16 sublanes)
    B_pad = _round_up(B, TB)
    if B_pad != B:
        x = jnp.concatenate([x, jnp.zeros((B_pad - B, INPUT_DIM), x.dtype)], axis=0)
    x_bf16 = x.astype(jnp.bfloat16)

    grid = (B_pad // TB,)

    flops_per_row = 2 * (INPUT_DIM * 64 + 64 * 48 + 48 * 32 + 32 * 32 + 32 * 1)
    cost = pl.CostEstimate(
        flops=flops_per_row * B_pad,
        transcendentals=(64 + 48 + 32) * B_pad,
        bytes_accessed=B_pad * (INPUT_DIM * 2 + OMIC_DIM * 4 + LABEL_DIM * 4)
        + wslab.size * 2 + bslab.size * 4,
    )

    feats, out = pl.pallas_call(
        maxnet_kernel,
        out_shape=(
            jax.ShapeDtypeStruct((B_pad, OMIC_DIM), jnp.float32),
            jax.ShapeDtypeStruct((B_pad, LABEL_DIM), jnp.float32),
        ),
        grid=grid,
        in_specs=[
            pl.BlockSpec((TB, INPUT_DIM), lambda i: (i, 0)),      # streamed x tiles
            pl.BlockSpec((WSLAB_ROWS, LANES), lambda i: (0, 0)),  # resident weights
            pl.BlockSpec((BSLAB_ROWS, LANES), lambda i: (0, 0)),  # resident biases
        ],
        out_specs=(
            pl.BlockSpec((TB, OMIC_DIM), lambda i: (i, 0)),
            pl.BlockSpec((TB, LABEL_DIM), lambda i: (i, 0)),
        ),
        compiler_params=pltpu.CompilerParams(
            dimension_semantics=("parallel",),
        ),
        cost_estimate=cost,
    )(x_bf16, wslab, bslab)

    return feats[:B], out[:B]


def init_params(key):
    """Deterministic test init (normal weights, std = 1/sqrt(fan_in); small biases)."""
    dims = [(INPUT_DIM, 64), (64, 48), (48, 32), (32, OMIC_DIM), (OMIC_DIM, LABEL_DIM)]
    names = ["1", "2", "3", "4", "c"]
    params = {}
    keys = jax.random.split(key, 2 * len(dims))
    for idx, ((fan_in, fan_out), n) in enumerate(zip(dims, names)):
        kw, kb = keys[2 * idx], keys[2 * idx + 1]
        std = 1.0 / jnp.sqrt(jnp.float32(fan_in))
        params[f"w{n}"] = jax.random.normal(kw, (fan_in, fan_out), jnp.float32) * std
        params[f"b{n}"] = jax.random.normal(kb, (1, fan_out), jnp.float32) * 0.1
    return params


def maxnet_reference(x, params):
    """Pure-JAX reference mirroring the kernel's bf16-matmul / f32-accumulate scheme."""
    def dense(h, w, b):
        return jnp.dot(h.astype(jnp.bfloat16), w.astype(jnp.bfloat16),
                       preferred_element_type=jnp.float32) + b
    h = x
    for n in ("1", "2", "3"):
        h = _elu(dense(h, params[f"w{n}"], params[f"b{n}"]))
    feats = jnp.maximum(dense(h, params["w4"], params["b4"]), 0.0)
    out = jnp.sum(feats * params["wc"].T, axis=-1, keepdims=True) + params["bc"]
    return feats, out


if __name__ == "__main__":
    key = jax.random.PRNGKey(0)
    kx, kp = jax.random.split(key)

    B = 8
    x = jax.random.normal(kx, (B, INPUT_DIM), jnp.float32)
    params = init_params(kp)

    feats, out = maxnet_forward(x, params)
    jax.block_until_ready((feats, out))

    feats_ref, out_ref = maxnet_reference(x, params)
    assert feats.shape == (B, OMIC_DIM) and out.shape == (B, LABEL_DIM)
    assert jnp.allclose(feats, feats_ref, atol=2e-3, rtol=2e-3), \
        float(jnp.max(jnp.abs(feats - feats_ref)))
    assert jnp.allclose(out, out_ref, atol=2e-3, rtol=2e-3), \
        float(jnp.max(jnp.abs(out - out_ref)))

    print("KERNEL_OK")
</pallas_src>

<mosaic_0001>
module attributes {stable_mosaic.version = 11 : i64} {
  func.func @maxnet_kernel(%arg0: i32, %arg1: memref<16x80xbf16, #tpu.memory_space<vmem>>, %arg2: memref<464x128xbf16, #tpu.memory_space<vmem>>, %arg3: memref<8x128xf32, #tpu.memory_space<vmem>>, %arg4: memref<16x32xf32, #tpu.memory_space<vmem>>, %arg5: memref<16x1xf32, #tpu.memory_space<vmem>>) attributes {dimension_semantics = [#tpu.dimension_semantics<parallel>], iteration_bounds = array<i64: 1>, scalar_prefetch = 0 : i64, scratch_operands = 0 : i64, tpu.core_type = #tpu.core_type<tc>, window_params = [{transform_indices = @transform_0, window_bounds = array<i64: 16, 80>}, {pipeline_mode = #tpu.pipeline_mode<synchronous>, transform_indices = @transform_1, window_bounds = array<i64: 464, 128>}, {pipeline_mode = #tpu.pipeline_mode<synchronous>, transform_indices = @transform_2, window_bounds = array<i64: 8, 128>}, {transform_indices = @transform_3, window_bounds = array<i64: 16, 32>}, {transform_indices = @transform_4, window_bounds = array<i64: 16, 1>}]} {
    %c0 = arith.constant 0 : index
    %c0_0 = arith.constant 0 : index
    %0 = vector.load %arg1[%c0, %c0_0] : memref<16x80xbf16, #tpu.memory_space<vmem>>, vector<16x80xbf16>
    %c0_1 = arith.constant 0 : index
    %c0_2 = arith.constant 0 : index
    %1 = vector.load %arg2[%c0_1, %c0_2] : memref<464x128xbf16, #tpu.memory_space<vmem>>, vector<80x128xbf16>
    %c80 = arith.constant 80 : index
    %c0_3 = arith.constant 0 : index
    %2 = vector.load %arg2[%c80, %c0_3] : memref<464x128xbf16, #tpu.memory_space<vmem>>, vector<128x128xbf16>
    %c208 = arith.constant 208 : index
    %c0_4 = arith.constant 0 : index
    %3 = vector.load %arg2[%c208, %c0_4] : memref<464x128xbf16, #tpu.memory_space<vmem>>, vector<128x128xbf16>
    %c336 = arith.constant 336 : index
    %c0_5 = arith.constant 0 : index
    %4 = vector.load %arg2[%c336, %c0_5] : memref<464x128xbf16, #tpu.memory_space<vmem>>, vector<128x128xbf16>
    %c0_6 = arith.constant 0 : index
    %c0_7 = arith.constant 0 : index
    %5 = vector.load %arg3[%c0_6, %c0_7] : memref<8x128xf32, #tpu.memory_space<vmem>>, vector<1x128xf32>
    %c1 = arith.constant 1 : index
    %c0_8 = arith.constant 0 : index
    %6 = vector.load %arg3[%c1, %c0_8] : memref<8x128xf32, #tpu.memory_space<vmem>>, vector<1x128xf32>
    %c2 = arith.constant 2 : index
    %c0_9 = arith.constant 0 : index
    %7 = vector.load %arg3[%c2, %c0_9] : memref<8x128xf32, #tpu.memory_space<vmem>>, vector<1x128xf32>
    %c3 = arith.constant 3 : index
    %c0_10 = arith.constant 0 : index
    %8 = vector.load %arg3[%c3, %c0_10] : memref<8x128xf32, #tpu.memory_space<vmem>>, vector<1x128xf32>
    %c4 = arith.constant 4 : index
    %c0_11 = arith.constant 0 : index
    %9 = vector.load %arg3[%c4, %c0_11] : memref<8x128xf32, #tpu.memory_space<vmem>>, vector<1x128xf32>
    %c5 = arith.constant 5 : index
    %c0_12 = arith.constant 0 : index
    %10 = vector.load %arg3[%c5, %c0_12] : memref<8x128xf32, #tpu.memory_space<vmem>>, vector<1x1xf32>
    %cst = arith.constant dense<0.000000e+00> : vector<16x128xf32>
    %11 = tpu.matmul %0, %1, %cst {dimension_numbers = #tpu.dot_dimension_numbers<[1], [0], [0], [1], [0, 0, 1, 1], [], []>} : vector<16x80xbf16>, vector<80x128xbf16>, vector<16x128xf32> -> vector<16x128xf32>
    %12 = vector.broadcast %5 : vector<1x128xf32> to vector<16x128xf32>
    %13 = arith.addf %11, %12 : vector<16x128xf32>
    %cst_13 = arith.constant 5.000000e-01 : f32
    %14 = vector.broadcast %cst_13 : f32 to vector<16x128xf32>
    %15 = arith.mulf %14, %13 : vector<16x128xf32>
    %16 = math.tanh %15 : vector<16x128xf32>
    %17 = math.exp %13 : vector<16x128xf32>
    %cst_14 = arith.constant 1.000000e+00 : f32
    %18 = vector.broadcast %cst_14 : f32 to vector<16x128xf32>
    %19 = arith.addf %17, %18 : vector<16x128xf32>
    %20 = arith.mulf %16, %19 : vector<16x128xf32>
    %cst_15 = arith.constant 0.000000e+00 : f32
    %21 = vector.broadcast %cst_15 : f32 to vector<16x128xf32>
    %22 = arith.cmpf ogt, %13, %21 : vector<16x128xf32>
    %23 = arith.select %22, %13, %20 : vector<16x128xi1>, vector<16x128xf32>
    %24 = arith.truncf %23 : vector<16x128xf32> to vector<16x128xbf16>
    %cst_16 = arith.constant dense<0.000000e+00> : vector<16x128xf32>
    %25 = tpu.matmul %24, %2, %cst_16 {dimension_numbers = #tpu.dot_dimension_numbers<[1], [0], [0], [1], [0, 0, 1, 1], [], []>} : vector<16x128xbf16>, vector<128x128xbf16>, vector<16x128xf32> -> vector<16x128xf32>
    %26 = vector.broadcast %6 : vector<1x128xf32> to vector<16x128xf32>
    %27 = arith.addf %25, %26 : vector<16x128xf32>
    %cst_17 = arith.constant 5.000000e-01 : f32
    %28 = vector.broadcast %cst_17 : f32 to vector<16x128xf32>
    %29 = arith.mulf %28, %27 : vector<16x128xf32>
    %30 = math.tanh %29 : vector<16x128xf32>
    %31 = math.exp %27 : vector<16x128xf32>
    %cst_18 = arith.constant 1.000000e+00 : f32
    %32 = vector.broadcast %cst_18 : f32 to vector<16x128xf32>
    %33 = arith.addf %31, %32 : vector<16x128xf32>
    %34 = arith.mulf %30, %33 : vector<16x128xf32>
    %cst_19 = arith.constant 0.000000e+00 : f32
    %35 = vector.broadcast %cst_19 : f32 to vector<16x128xf32>
    %36 = arith.cmpf ogt, %27, %35 : vector<16x128xf32>
    %37 = arith.select %36, %27, %34 : vector<16x128xi1>, vector<16x128xf32>
    %38 = arith.truncf %37 : vector<16x128xf32> to vector<16x128xbf16>
    %cst_20 = arith.constant dense<0.000000e+00> : vector<16x128xf32>
    %39 = tpu.matmul %38, %3, %cst_20 {dimension_numbers = #tpu.dot_dimension_numbers<[1], [0], [0], [1], [0, 0, 1, 1], [], []>} : vector<16x128xbf16>, vector<128x128xbf16>, vector<16x128xf32> -> vector<16x128xf32>
    %40 = vector.broadcast %7 : vector<1x128xf32> to vector<16x128xf32>
    %41 = arith.addf %39, %40 : vector<16x128xf32>
    %cst_21 = arith.constant 5.000000e-01 : f32
    %42 = vector.broadcast %cst_21 : f32 to vector<16x128xf32>
    %43 = arith.mulf %42, %41 : vector<16x128xf32>
    %44 = math.tanh %43 : vector<16x128xf32>
    %45 = math.exp %41 : vector<16x128xf32>
    %cst_22 = arith.constant 1.000000e+00 : f32
    %46 = vector.broadcast %cst_22 : f32 to vector<16x128xf32>
    %47 = arith.addf %45, %46 : vector<16x128xf32>
    %48 = arith.mulf %44, %47 : vector<16x128xf32>
    %cst_23 = arith.constant 0.000000e+00 : f32
    %49 = vector.broadcast %cst_23 : f32 to vector<16x128xf32>
    %50 = arith.cmpf ogt, %41, %49 : vector<16x128xf32>
    %51 = arith.select %50, %41, %48 : vector<16x128xi1>, vector<16x128xf32>
    %52 = arith.truncf %51 : vector<16x128xf32> to vector<16x128xbf16>
    %cst_24 = arith.constant dense<0.000000e+00> : vector<16x128xf32>
    %53 = tpu.matmul %52, %4, %cst_24 {dimension_numbers = #tpu.dot_dimension_numbers<[1], [0], [0], [1], [0, 0, 1, 1], [], []>} : vector<16x128xbf16>, vector<128x128xbf16>, vector<16x128xf32> -> vector<16x128xf32>
    %54 = vector.broadcast %8 : vector<1x128xf32> to vector<16x128xf32>
    %55 = arith.addf %53, %54 : vector<16x128xf32>
    %cst_25 = arith.constant 0.000000e+00 : f32
    %56 = vector.broadcast %cst_25 : f32 to vector<16x128xf32>
    %57 = arith.maximumf %55, %56 : vector<16x128xf32>
    %58 = vector.extract_strided_slice %57 {offsets = [0, 0], sizes = [16, 32], strides = [1, 1]} : vector<16x128xf32> to vector<16x32xf32>
    %c0_26 = arith.constant 0 : index
    %c0_27 = arith.constant 0 : index
    %59 = vector.load %arg4[%c0_26, %c0_27] : memref<16x32xf32, #tpu.memory_space<vmem>>, vector<16x32xf32>
    tpu.vector_store %arg4[%c0_26, %c0_27], %58 {strides = array<i32>} : memref<16x32xf32, #tpu.memory_space<vmem>>, vector<16x32xf32>,
    %60 = vector.broadcast %9 : vector<1x128xf32> to vector<16x128xf32>
    %61 = arith.mulf %57, %60 : vector<16x128xf32>
    %cst_28 = arith.constant dense<0.000000e+00> : vector<16xf32>
    %62 = vector.multi_reduction <add>, %61, %cst_28 [1] : vector<16x128xf32> to vector<16xf32>
    %63 = vector.shape_cast %62 : vector<16xf32> to vector<16x1xf32>
    %64 = vector.broadcast %10 : vector<1x1xf32> to vector<16x1xf32>
    %65 = arith.addf %63, %64 : vector<16x1xf32>
    %c0_29 = arith.constant 0 : index
    %c0_30 = arith.constant 0 : index
    %66 = vector.load %arg5[%c0_29, %c0_30] : memref<16x1xf32, #tpu.memory_space<vmem>>, vector<16x1xf32>
    tpu.vector_store %arg5[%c0_29, %c0_30], %65 {strides = array<i32>} : memref<16x1xf32, #tpu.memory_space<vmem>>, vector<16x1xf32>,
    return
  }
  func.func @transform_0(%arg0: i32) -> (i32, i32) {
    %c0_i32 = arith.constant 0 : i32
    %c0_i32_0 = arith.constant 0 : i32
    return %arg0, %c0_i32 : i32, i32
  }
  func.func @transform_1(%arg0: i32) -> (i32, i32) {
    %c0_i32 = arith.constant 0 : i32
    %c0_i32_0 = arith.constant 0 : i32
    %c0_i32_1 = arith.constant 0 : i32
    return %c0_i32, %c0_i32_0 : i32, i32
  }
  func.func @transform_2(%arg0: i32) -> (i32, i32) {
    %c0_i32 = arith.constant 0 : i32
    %c0_i32_0 = arith.constant 0 : i32
    %c0_i32_1 = arith.constant 0 : i32
    return %c0_i32, %c0_i32_0 : i32, i32
  }
  func.func @transform_3(%arg0: i32) -> (i32, i32) {
    %c0_i32 = arith.constant 0 : i32
    %c0_i32_0 = arith.constant 0 : i32
    return %arg0, %c0_i32 : i32, i32
  }
  func.func @transform_4(%arg0: i32) -> (i32, i32) {
    %c0_i32 = arith.constant 0 : i32
    %c0_i32_0 = arith.constant 0 : i32
    return %arg0, %c0_i32 : i32, i32
  }
}

</mosaic_0001>

<bundles_post_ra>
// kernel: tpu_custom_call.1
= control target key start
LH: loop header
LB: loop body
LE: loop exit
PB: predicated region body
PF: predicated region fallthrough
CT: control target
= control target key end

     0   :  { %10 = vsyncpa [#allocation3], 0  ;;  %s807_s0 = inlined_call_operand.hbm [shape: bf16[16,80], index: 0, kind: input, shape index: {}]   ;;  %s808_s1 = inlined_call_operand.hbm [shape: bf16[464,128], index: 1, kind: input, shape index: {}]   ;;  %s809_s2 = inlined_call_operand.hbm [shape: f32[8,128], index: 2, kind: input, shape index: {}]   ;;  %s810_s3 = inlined_call_operand.hbm [shape: f32[16,32], index: 3, kind: output, shape index: {0}]   ;;  %s811_s4 = inlined_call_operand.vmem [shape: f32[16,1], index: 4, kind: output, shape index: {1}]  }
   0x1   :  { %11 = vsyncpa [#allocation6], 0 }
   0x2   :  { %12 = vsyncpa [#allocation4], 0  ;;  %s30_s17 = sshll.u32 %s808_s1, 4  ;;  %s756_s18 = smov [#allocation5]   ;;  %s31_s17 = int_to_ptr.hbm [resolvable:$true] %s30_s17 }
   0x3   :  { %s32_s19 = sshll.u32 %s756_s18, 4  ;;  %s17_s22 = sshll.u32 %s807_s0, 4  ;;  %s33_s19 = int_to_ptr.vmem [resolvable:$true] %s32_s19  ;;  %s18_s22 = int_to_ptr.hbm [resolvable:$true] %s17_s22 }
   0x4   :  { %s757_s23 = smov 64   ;;  %s758_s24 = smov 4  }
   0x5   :  { %38 = dma.hbm_to_vmem [thread:$0]  %s31_s17, 3712, %s33_s19, [#allocation6], %s757_s23, %s757_s23, %s758_s24  }
   0x6   :  { %s759_s25 = smov [#allocation2]   ;;  %s44_s29 = sshll.u32 %s809_s2, 4  ;;  %s45_s29 = int_to_ptr.hbm [resolvable:$true] %s44_s29 }
   0x7   :  { %s19_s26 = sshll.u32 %s759_s25, 4  ;;  %s760_s1 = smov [#allocation7]   ;;  %s20_s26 = int_to_ptr.vmem [resolvable:$true] %s19_s26 }
   0x8   :  { %25 = dma.hbm_to_vmem [thread:$0]  %s18_s22, 128, %s20_s26, [#allocation3], %s757_s23, %s757_s23, %s758_s24  }
   0x9   :  { %s46_s30 = sshll.u32 %s760_s1, 4  ;;  %s47_s30 = int_to_ptr.vmem [resolvable:$true] %s46_s30 }
   0xa   :  { %49 = dma.hbm_to_vmem [thread:$0]  %s45_s29, 128, %s47_s30, [#allocation6]  }
   0xb   :  { %750 = dma.done.wait [#allocation3], 128  }
   0xc   :  { %751 = vsyncadd [#allocation3], 4294967168 }
   0xd   :  { %752 = dma.done.wait [#allocation6], 3840  }
   0xe   :  { %753 = vsyncadd [#allocation6], 4294963456  ;;  %v591_v0 = vld [vmem:[#allocation5 + $0x20] sm:$0xff]  ;;  %v590_v1 = vld [vmem:[#allocation5 + $0x18] sm:$0xff]  ;;  %vm165_vm0 = vcmask 654336   ;;  %vm425_vm7 = vcmask 261120  }
   0xf   :  { %172 = vmatpush.bf16.msra.mxu0 %v591_v0  ;;  %v599_v2 = vld [vmem:[#allocation5 + $0x60] sm:$0xff]  ;;  %v589_v3 = vld [vmem:[#allocation5 + $0x10] sm:$0xff]  ;;  %v588_v4 = vld [vmem:[#allocation5 + $0x8] sm:$0xff]  ;;  %s761_s0 = smov [#allocation8]   ;;  %s447_s7 = sshll.u32 %s810_s3, 4  ;;  %vm438_vm8 = vcmask 7168   ;;  %s448_s7 = int_to_ptr.hbm [resolvable:$true] %s447_s7 }
  0x10   :  { %249 = vmatpush.bf16.msra.mxu1 %v599_v2  ;;  %v587_v5 = vld [vmem:[#allocation5] sm:$0xff]  ;;  %v586_v6 = vld [vmem:[#allocation2] sm:$0xff]  ;;  %v597_v8 = vld [vmem:[#allocation5 + $0x50] sm:$0xff]  ;;  %s445_s2 = sshll.u32 %s761_s0, 4  ;;  %s762_s8 = smov 128   ;;  %s446_s2 = int_to_ptr.vmem [resolvable:$true] %s445_s2 }
  0x11   :  { %v598_v7 = vld [vmem:[#allocation5 + $0x58] sm:$0xff]  ;;  %v596_v9 = vld [vmem:[#allocation5 + $0x48] sm:$0xff]  ;;  %v595_v10 = vld [vmem:[#allocation5 + $0x40] sm:$0xff]  ;;  %s763_s9 = smov 8  }
  0x12   :  { %v594_v11 = vld [vmem:[#allocation5 + $0x38] sm:$0xff]  ;;  %v593_v12 = vld [vmem:[#allocation5 + $0x30] sm:$0xff]  ;;  %v592_v13 = vld [vmem:[#allocation5 + $0x28] sm:$0xff] }
  0x13   :  { %173 = vmatpush.bf16.msra.mxu0 %v590_v1  ;;  %v607_v14 = vld [vmem:[#allocation5 + $0xa0] sm:$0xff]  ;;  %v624_v15 = vld [vmem:[#allocation7] ss:$0 sm:$0xff]  ;;  %v606_v35 = vld [vmem:[#allocation5 + $0x98] sm:$0xff] }
  0x14   :  { %250 = vmatpush.bf16.msra.mxu1 %v598_v7  ;;  %329 = vmatpush.bf16.msra.mxu2 %v607_v14  ;;  %v605_v36 = vld [vmem:[#allocation5 + $0x90] sm:$0xff]  ;;  %v604_v37 = vld [vmem:[#allocation5 + $0x88] sm:$0xff]  ;;  %v603_v38 = vld [vmem:[#allocation5 + $0x80] sm:$0xff] }
  0x15   :  { %v602_v39 = vld [vmem:[#allocation5 + $0x78] sm:$0xff]  ;;  %v601_v40 = vld [vmem:[#allocation5 + $0x70] sm:$0xff]  ;;  %v600_v41 = vld [vmem:[#allocation5 + $0x68] sm:$0xff] }
  0x16   :  { %v615_v42 = vld [vmem:[#allocation5 + $0xe0] sm:$0xff]  ;;  %v625_v43 = vld [vmem:[#allocation7 + $0x1] ss:$0 sm:$0xff]  ;;  %v614_v63 = vld [vmem:[#allocation5 + $0xd8] sm:$0xff] }
  0x17   :  { %174 = vmatpush.bf16.msra.mxu0 %v589_v3  ;;  %409 = vmatpush.bf16.msra.mxu3 %v615_v42  ;;  %v613_v0 = vld [vmem:[#allocation5 + $0xd0] sm:$0xff]  ;;  %v612_v1 = vld [vmem:[#allocation5 + $0xc8] sm:$0xff]  ;;  %v611_v2 = vld [vmem:[#allocation5 + $0xc0] sm:$0xff] }
  0x18   :  { %251 = vmatpush.bf16.msra.mxu1 %v597_v8  ;;  %330 = vmatpush.bf16.msra.mxu2 %v606_v35  ;;  %v610_v3 = vld [vmem:[#allocation5 + $0xb8] sm:$0xff] }
  0x1b   :  { %175 = vmatpush.bf16.msra.mxu0 %v588_v4  ;;  %410 = vmatpush.bf16.msra.mxu3 %v614_v63  ;;  %v609_v4 = vld [vmem:[#allocation5 + $0xb0] sm:$0xff] }
  0x1c   :  { %252 = vmatpush.bf16.msra.mxu1 %v596_v9  ;;  %331 = vmatpush.bf16.msra.mxu2 %v605_v36  ;;  %v629_v36 = vld [vmem:[#allocation7 + $0x5] ss:$0 sm:$0xff] }
  0x1f   :  { %176 = vmatpush.bf16.msra.mxu0 %v587_v5  ;;  %411 = vmatpush.bf16.msra.mxu3 %v613_v0  ;;  %v608_v5 = vld [vmem:[#allocation5 + $0xa8] sm:$0xff] }
  0x20   :  { %253 = vmatpush.bf16.msra.mxu1 %v595_v10  ;;  %332 = vmatpush.bf16.msra.mxu2 %v604_v37 }
  0x22   :  { %489 = vmatmul.msk.bf16.vlgmr.msra.gmra.mxu0 %vm165_vm0, %v586_v6  ;;  %v626_v6 = vld [vmem:[#allocation7 + $0x2] ss:$0 sm:$0xff] }
  0x23   :  { %412 = vmatpush.bf16.msra.mxu3 %v612_v1 }
  0x24   :  { %254 = vmatpush.bf16.msra.mxu1 %v594_v11  ;;  %333 = vmatpush.bf16.msra.mxu2 %v603_v38 }
  0x27   :  { %413 = vmatpush.bf16.msra.mxu3 %v611_v2 }
  0x28   :  { %255 = vmatpush.bf16.msra.mxu1 %v593_v12  ;;  %334 = vmatpush.bf16.msra.mxu2 %v602_v39 }
  0x2b   :  { %414 = vmatpush.bf16.msra.mxu3 %v610_v3 }
  0x2c   :  { %256 = vmatpush.bf16.msra.mxu1 %v592_v13  ;;  %335 = vmatpush.bf16.msra.mxu2 %v601_v40 }
  0x2f   :  { %415 = vmatpush.bf16.msra.mxu3 %v609_v4 }
  0x30   :  { %336 = vmatpush.bf16.msra.mxu2 %v600_v41 }
  0x33   :  { %416 = vmatpush.bf16.msra.mxu3 %v608_v5 }
  0x9f   :  { %v178_v16 = vpop.f32.mrf.mxu0 }
  0xa0   :  { %v179_v17 = vadd.f32 %v624_v15, %v178_v16 }
  0xa2   :  { %v187_v18 = vmul.f32 1.442695, %v179_v17  ;;  %v183_v20 = vmul.f32 0.5, %v179_v17  ;;  %vm195_vm1 = vcmp.gt.f32.partialorder %v179_v17, 0.0 }
  0xa4   :  { %630 = vpow2.f32 %v187_v18 }
  0xa5   :  { %632 = vtanh.f32 %v183_v20 }
  0xa7   :  { %v180_v19 = vpop.f32.mrf.mxu0 }
  0xa8   :  { %v181_v21 = vadd.f32 %v624_v15, %v180_v19 }
  0xaa   :  { %v189_v22 = vmul.f32 1.442695, %v181_v21  ;;  %v184_v23 = vmul.f32 0.5, %v181_v21  ;;  %v631_v24 = vpop.eup %630  ;;  %vm196_vm2 = vcmp.gt.f32.partialorder %v181_v21, 0.0 }
  0xab   :  { %v191_v25 = vadd.f32 1.0, %v631_v24  ;;  %v633_v26 = vpop.eup %632 }
  0xac   :  { %634 = vpow2.f32 %v189_v22 }
  0xad   :  { %636 = vtanh.f32 %v184_v23  ;;  %v193_v29 = vmul.f32 %v633_v26, %v191_v25  ;;  %v627_v26 = vld [vmem:[#allocation7 + $0x3] ss:$0 sm:$0xff] }
  0xaf   :  { %v197_v32 = vsel %vm195_vm1, %v179_v17, %v193_v29  ;;  %v628_v29 = vld [vmem:[#allocation7 + $0x4] ss:$0 sm:$0xff] }
  0xb2   :  { %v635_v27 = vpop.eup %634 }
  0xb3   :  { %v192_v28 = vadd.f32 1.0, %v635_v27  ;;  %v637_v30 = vpop.eup %636 }
  0xb5   :  { %v194_v31 = vmul.f32 %v637_v30, %v192_v28 }
  0xb7   :  { %v198_v33 = vsel %vm196_vm2, %v181_v21, %v194_v31 }
  0xb8   :  { %v199_v34 = vpack.c.bf16 %v198_v33, %v197_v32 }
  0xba   :  { %257 = vmatmul.bf16.vlgmr.msra.gmra.mxu1 %v199_v34 }
 0x137   :  { %v258_v44 = vpop.f32.mrf.mxu1 }
 0x138   :  { %v259_v45 = vadd.f32 %v625_v43, %v258_v44 }
 0x13a   :  { %v267_v46 = vmul.f32 1.442695, %v259_v45  ;;  %v263_v48 = vmul.f32 0.5, %v259_v45  ;;  %vm275_vm3 = vcmp.gt.f32.partialorder %v259_v45, 0.0 }
 0x13c   :  { %638 = vpow2.f32 %v267_v46 }
 0x13d   :  { %640 = vtanh.f32 %v263_v48 }
 0x13f   :  { %v260_v47 = vpop.f32.mrf.mxu1 }
 0x140   :  { %v261_v49 = vadd.f32 %v625_v43, %v260_v47 }
 0x142   :  { %v269_v50 = vmul.f32 1.442695, %v261_v49  ;;  %v264_v51 = vmul.f32 0.5, %v261_v49  ;;  %v639_v52 = vpop.eup %638  ;;  %vm276_vm4 = vcmp.gt.f32.partialorder %v261_v49, 0.0 }
 0x143   :  { %v271_v53 = vadd.f32 1.0, %v639_v52  ;;  %v641_v54 = vpop.eup %640 }
 0x144   :  { %642 = vpow2.f32 %v269_v50 }
 0x145   :  { %644 = vtanh.f32 %v264_v51  ;;  %v273_v57 = vmul.f32 %v641_v54, %v271_v53 }
 0x147   :  { %v277_v60 = vsel %vm275_vm3, %v259_v45, %v273_v57 }
 0x14a   :  { %v643_v55 = vpop.eup %642 }
 0x14b   :  { %v272_v56 = vadd.f32 1.0, %v643_v55  ;;  %v645_v58 = vpop.eup %644 }
 0x14d   :  { %v274_v59 = vmul.f32 %v645_v58, %v272_v56 }
 0x14f   :  { %v278_v61 = vsel %vm276_vm4, %v261_v49, %v274_v59 }
 0x150   :  { %v279_v62 = vpack.c.bf16 %v278_v61, %v277_v60 }
 0x152   :  { %337 = vmatmul.bf16.vlgmr.msra.gmra.mxu2 %v279_v62 }
 0x1d5   :  { %v338_v7 = vpop.f32.mrf.mxu2 }
 0x1d6   :  { %v339_v8 = vadd.f32 %v626_v6, %v338_v7 }
 0x1d8   :  { %v347_v9 = vmul.f32 1.442695, %v339_v8  ;;  %v343_v11 = vmul.f32 0.5, %v339_v8  ;;  %vm355_vm5 = vcmp.gt.f32.partialorder %v339_v8, 0.0 }
 0x1da   :  { %646 = vpow2.f32 %v347_v9 }
 0x1db   :  { %648 = vtanh.f32 %v343_v11 }
 0x1dd   :  { %v340_v10 = vpop.f32.mrf.mxu2 }
 0x1de   :  { %v341_v12 = vadd.f32 %v626_v6, %v340_v10 }
 0x1e0   :  { %v349_v13 = vmul.f32 1.442695, %v341_v12  ;;  %v344_v14 = vmul.f32 0.5, %v341_v12  ;;  %v647_v15 = vpop.eup %646  ;;  %vm356_vm6 = vcmp.gt.f32.partialorder %v341_v12, 0.0 }
 0x1e1   :  { %v351_v16 = vadd.f32 1.0, %v647_v15  ;;  %v649_v17 = vpop.eup %648 }
 0x1e2   :  { %650 = vpow2.f32 %v349_v13 }
 0x1e3   :  { %652 = vtanh.f32 %v344_v14  ;;  %v353_v20 = vmul.f32 %v649_v17, %v351_v16 }
 0x1e5   :  { %v357_v23 = vsel %vm355_vm5, %v339_v8, %v353_v20 }
 0x1e8   :  { %v651_v18 = vpop.eup %650 }
 0x1e9   :  { %v352_v19 = vadd.f32 1.0, %v651_v18  ;;  %v653_v21 = vpop.eup %652 }
 0x1eb   :  { %v354_v22 = vmul.f32 %v653_v21, %v352_v19 }
 0x1ed   :  { %v358_v24 = vsel %vm356_vm6, %v341_v12, %v354_v22 }
 0x1ee   :  { %v359_v25 = vpack.c.bf16 %v358_v24, %v357_v23 }
 0x1f0   :  { %417 = vmatmul.bf16.vlgmr.msra.gmra.mxu3 %v359_v25 }
 0x273   :  { %v418_v27 = vpop.f32.mrf.mxu3 }
 0x274   :  { %v419_v28 = vadd.f32 %v627_v26, %v418_v27 }
 0x276   :  { %v423_v30 = vmax.f32 %v419_v28, 0.0 }
 0x278   :  { %426 = vst.msk [vmem:[#allocation8] sm:$0xff] %vm425_vm7, %v423_v30  ;;  %v429_v31 = vmul.f32 %v628_v29, %v423_v30 }
 0x27a   :  { %431 = vadd.xlane.f32.xlu0 %v429_v31 }
 0x27b   :  { %v420_v32 = vpop.f32.mrf.mxu3 }
 0x27c   :  { %v421_v33 = vadd.f32 %v627_v26, %v420_v32 }
 0x27e   :  { %v424_v34 = vmax.f32 %v421_v33, 0.0 }
 0x280   :  { %427 = vst.msk [vmem:[#allocation8 + $0x8] sm:$0xff] %vm425_vm7, %v424_v34  ;;  %v430_v35 = vmul.f32 %v628_v29, %v424_v34 }
 0x281   :  { %453 = dma.vmem_to_hbm [thread:$0]  %s446_s2, 256, %s448_s7, [#allocation4], %s762_s8, %s762_s8, %s763_s9  }
 0x282   :  { %433 = vadd.xlane.f32.xlu0 %v430_v35 }
 0x2ed   :  { %v432_v37 = vpop.xlane.xlu0 %431 }
 0x2ee   :  { %v436_v38 = vadd.f32 %v629_v36, %v432_v37 }
 0x2f0   :  { %439 = vst.msk [vmem:[%s811_s4] sm:$0xff] %vm438_vm8, %v436_v38 }
 0x2f5   :  { %v434_v39 = vpop.xlane.xlu0 %433 }
 0x2f6   :  { %v437_v40 = vadd.f32 %v629_v36, %v434_v39 }
 0x2f8   :  { %440 = vst.msk [vmem:[%s811_s4 + $0x8] sm:$0xff] %vm438_vm8, %v437_v40 }
 0x2f9   :  { %754 = dma.done.wait [#allocation4], 256  }
 0x2fa   :  { %755 = vsyncadd [#allocation4], 4294967040 }
 0x2fb   :  { %462 = vsyncpa [#allocation3], 1 }
 0x2fc   :  { %463 = vsyncpa [#allocation6], 1 }
 0x2fd   :  { %464 = vsyncpa [#allocation4], 1 }

</bundles_post_ra>
